<compile_context>
chip_gen: v7x
topology: tpu7x:2x2x1
jax: 0.10.0
libtpu: 0.0.40
codegen_flags: <defaults>
</compile_context>

<pallas_src>
import functools
import itertools

import numpy as np
import jax
import jax.numpy as jnp
from jax.experimental import pallas as pl
from jax.experimental.pallas import tpu as pltpu


def _round_up(x, m):
    return ((x + m - 1) // m) * m


# ----------------------------------------------------------------------------- kernel
def _cost_kernel(logits_ref, oboxn_ref, obox_ref, onehot_ref, tboxnT_ref, tboxT_ref,
                 cost_ref, *, w_bbox, w_giou):
    # ---- softmax over classes (VPU + EUP); logits arrive bf16, compute in f32 ----
    logits = logits_ref[...].astype(jnp.float32)             # [TN, Cp]
    m = jnp.max(logits, axis=-1, keepdims=True)
    e = jnp.exp(logits - m)
    prob = e * pl.reciprocal(jnp.sum(e, axis=-1, keepdims=True), approx=True)   # [TN, Cp]

    # ---- w_class * (-prob[:, tgt_ids]) via precomputed one-hot matmul on the MXU ----
    # onehot_ref is [Cp, NT] bf16 and already carries -w_class, so no epilogue scale.
    cost = jnp.dot(prob.astype(jnp.bfloat16), onehot_ref[...],
                   preferred_element_type=jnp.float32)                          # [TN, NT]

    # ---- cost_bbox: L1 cdist on normalized boxes, unrolled over the 4 coords ----
    obn = oboxn_ref[...]                                      # [TN, 4]  normalized xyxy
    tbn = tboxnT_ref[...]                                     # [4, NT]  normalized xyxy (transposed)
    l1 = jnp.abs(obn[:, 0:1] - tbn[0:1, :])
    for k in range(1, 4):
        l1 = l1 + jnp.abs(obn[:, k:k + 1] - tbn[k:k + 1, :])
    cost = cost + w_bbox * l1                                 # l1 dead after this

    # ---- cost_giou = -generalized_box_iou(out_bbox, tgt_bbox) (absolute boxes) ----
    # Broadcasts folded into consumers; x terms fully before y terms to keep the
    # number of live [TN, NT] f32 temporaries small.
    ob = obox_ref[...]                                        # [TN, 4]  absolute xyxy
    tb = tboxT_ref[...]                                       # [4, NT]  absolute xyxy (transposed)
    x1 = ob[:, 0:1]; y1 = ob[:, 1:2]; x2 = ob[:, 2:3]; y2 = ob[:, 3:4]          # [TN, 1]
    tx1 = tb[0:1, :]; ty1 = tb[1:2, :]; tx2 = tb[2:3, :]; ty2 = tb[3:4, :]      # [1, NT]

    iw = jnp.maximum(jnp.minimum(x2, tx2) - jnp.maximum(x1, tx1), 0.0)          # [TN, NT]
    cw = jnp.maximum(jnp.maximum(x2, tx2) - jnp.minimum(x1, tx1), 0.0)          # [TN, NT]
    ih = jnp.maximum(jnp.minimum(y2, ty2) - jnp.maximum(y1, ty1), 0.0)          # [TN, NT]
    ch = jnp.maximum(jnp.maximum(y2, ty2) - jnp.minimum(y1, ty1), 0.0)          # [TN, NT]

    inter = iw * ih                                           # iw, ih dead
    carea = cw * ch                                           # cw, ch dead

    area1 = (x2 - x1) * (y2 - y1)                             # [TN, 1]
    area2 = (tx2 - tx1) * (ty2 - ty1)                         # [1, NT]
    union = (area1 + area2) - inter                           # implicit broadcast -> [TN, NT]

    # NOTE: like the PyTorch reference, degenerate (zero-area / zero-enclosure) boxes
    # divide by zero; the host glue pads with unit boxes so padded lanes stay finite.
    giou = (inter * pl.reciprocal(union, approx=False) - 1.0
            + union * pl.reciprocal(carea, approx=False))     # == iou - (carea - union)/carea

    cost_ref[...] = cost - w_giou * giou


# ----------------------------------------------------------------------------- wrapper
@functools.partial(jax.jit,
                   static_argnames=("cost_class", "cost_bbox", "cost_giou", "tile_n"))
def compute_cost_matrix(logits, out_bbox, out_bbox_norm, tgt_ids, tgt_bbox, tgt_bbox_norm,
                        *, cost_class=1.0, cost_bbox=1.0, cost_giou=1.0, tile_n=256):
    """Returns the [N, NT] matching-cost matrix (float32)."""
    N, NC = logits.shape
    NT = int(tgt_ids.shape[0])

    # Lane-dense padding: classes and targets up to multiples of 128.
    NC_pad = _round_up(max(NC, 1), 128)
    NT_pad = _round_up(max(NT, 1), 128)

    # Row tile: multiple of 16 (legal bf16 sublane packing for the logits block).
    # tile_n=256 amortizes per-step overhead and fills the v6e MXU M-dim; with the
    # reduced temporary count it stays well inside the 32 MiB scoped VMEM on v7x.
    tile_n = _round_up(max(16, min(int(tile_n), _round_up(N, 16))), 16)
    N_pad = _round_up(N, tile_n)

    # Pad logits (bf16): extra classes / extra rows get -1e30 so softmax ignores them.
    logits_p = jnp.pad(logits.astype(jnp.float32),
                       ((0, N_pad - N), (0, NC_pad - NC)),
                       constant_values=-1e30).astype(jnp.bfloat16)

    dummy_box = jnp.array([0.0, 0.0, 1.0, 1.0], jnp.float32)   # unit box keeps GIoU finite

    def _pad_boxes(x, n_extra):
        x = x.astype(jnp.float32)
        if n_extra == 0:
            return x
        return jnp.concatenate([x, jnp.tile(dummy_box[None, :], (n_extra, 1))], axis=0)

    ob_p = _pad_boxes(out_bbox, N_pad - N)           # [N_pad, 4]   absolute
    obn_p = _pad_boxes(out_bbox_norm, N_pad - N)     # [N_pad, 4]   normalized
    tbT = _pad_boxes(tgt_bbox, NT_pad - NT).T        # [4, NT_pad]  absolute
    tbnT = _pad_boxes(tgt_bbox_norm, NT_pad - NT).T  # [4, NT_pad]  normalized

    # Grid-invariant one-hot gather matrix, built ONCE here (not per tile in-kernel);
    # it already carries -cost_class so the kernel needs no epilogue multiply.
    ids_p = jnp.pad(tgt_ids.astype(jnp.int32), (0, NT_pad - NT))                 # [NT_pad]
    class_iota = jnp.arange(NC_pad, dtype=jnp.int32)[:, None]                    # [NC_pad, 1]
    onehot = jnp.where(class_iota == ids_p[None, :],
                       jnp.float32(-cost_class), jnp.float32(0.0)).astype(jnp.bfloat16)

    kernel = functools.partial(_cost_kernel, w_bbox=float(cost_bbox), w_giou=float(cost_giou))

    out = pl.pallas_call(
        kernel,
        out_shape=jax.ShapeDtypeStruct((N_pad, NT_pad), jnp.float32),
        grid=(N_pad // tile_n,),
        in_specs=[
            pl.BlockSpec((tile_n, NC_pad), lambda i: (i, 0)),    # logits (bf16, tiled over rows)
            pl.BlockSpec((tile_n, 4), lambda i: (i, 0)),         # normalized pred boxes
            pl.BlockSpec((tile_n, 4), lambda i: (i, 0)),         # absolute pred boxes
            pl.BlockSpec((NC_pad, NT_pad), lambda i: (0, 0)),    # one-hot (-w_class), VMEM-resident
            pl.BlockSpec((4, NT_pad), lambda i: (0, 0)),         # normalized tgt boxes^T
            pl.BlockSpec((4, NT_pad), lambda i: (0, 0)),         # absolute tgt boxes^T
        ],
        out_specs=pl.BlockSpec((tile_n, NT_pad), lambda i: (i, 0)),
        compiler_params=pltpu.CompilerParams(
            dimension_semantics=("parallel",),                   # shards row tiles across v7x's 2 TCs
            vmem_limit_bytes=32 * 1024 * 1024),
    )(logits_p, obn_p, ob_p, onehot, tbnT, tbT)

    return out[:N, :NT]


# ----------------------------------------------------------------------------- host glue
def _linear_sum_assignment_small(cost):
    """Exact brute-force assignment for tiny problems (replaces scipy's LSA).
    Assumes n_cols <= n_rows, matching the matcher's usage."""
    # TODO(synk): linear_sum_assignment (Hungarian) is sequential host-side logic; not a Pallas kernel.
    n_rows, n_cols = cost.shape
    best_rows, best_cost = None, np.inf
    for rows in itertools.permutations(range(n_rows), n_cols):
        c = sum(cost[r, j] for j, r in enumerate(rows))
        if c < best_cost:
            best_cost, best_rows = c, rows
    pairs = sorted(zip(best_rows, range(n_cols)))
    row_idx = np.array([p[0] for p in pairs], dtype=np.int64)
    col_idx = np.array([p[1] for p in pairs], dtype=np.int64)
    return row_idx, col_idx


class HungarianMatcher:
    """JAX/Pallas port of the SparseRCNN HungarianMatcher (use_focal=False path)."""

    def __init__(self, cost_class=1.0, cost_bbox=1.0, cost_giou=1.0, use_focal=False, tile_n=256):
        assert cost_class != 0 or cost_bbox != 0 or cost_giou != 0, "all costs cant be 0"
        # TODO(synk): focal-loss cost branch (use_focal=True) not implemented.
        assert not use_focal
        self.cost_class, self.cost_bbox, self.cost_giou = cost_class, cost_bbox, cost_giou
        self.tile_n = tile_n

    def __call__(self, outputs, targets):
        bs, num_queries, num_classes = outputs["pred_logits"].shape
        logits = outputs["pred_logits"].reshape(bs * num_queries, num_classes)
        out_bbox = outputs["pred_boxes"].reshape(bs * num_queries, 4).astype(jnp.float32)

        # normalize pred boxes once in the wrapper (no [N,4] image-size kernel input)
        image_size_out = jnp.stack([t["image_size_xyxy"] for t in targets], axis=0)      # [bs, 4]
        image_size_out = jnp.repeat(image_size_out[:, None, :], num_queries, axis=1)
        image_size_out = image_size_out.reshape(bs * num_queries, 4).astype(jnp.float32)
        out_bbox_norm = out_bbox / image_size_out

        tgt_ids = jnp.concatenate([t["labels"] for t in targets]).astype(jnp.int32)
        tgt_bbox = jnp.concatenate([t["boxes_xyxy"] for t in targets], axis=0).astype(jnp.float32)
        image_size_tgt = jnp.concatenate([t["image_size_xyxy_tgt"] for t in targets],
                                         axis=0).astype(jnp.float32)
        tgt_bbox_norm = tgt_bbox / image_size_tgt

        C = compute_cost_matrix(
            logits.astype(jnp.float32), out_bbox, out_bbox_norm, tgt_ids, tgt_bbox, tgt_bbox_norm,
            cost_class=float(self.cost_class), cost_bbox=float(self.cost_bbox),
            cost_giou=float(self.cost_giou), tile_n=int(self.tile_n))
        C = C.reshape(bs, num_queries, -1)

        sizes = [int(t["boxes"].shape[0]) for t in targets]
        C_np = np.asarray(jax.device_get(C))
        indices, start = [], 0
        for i, sz in enumerate(sizes):
            row, col = _linear_sum_assignment_small(C_np[i, :, start:start + sz])
            indices.append((row, col))
            start += sz
        return indices, C


# ----------------------------------------------------------------------------- reference
def _reference_cost(logits, out_bbox, imgsz_out, tgt_ids, tgt_bbox, imgsz_tgt, wc, wb, wg):
    prob = jax.nn.softmax(logits.astype(jnp.float32), axis=-1)
    cost_class = -prob[:, tgt_ids]
    obn = out_bbox / imgsz_out
    tbn = tgt_bbox / imgsz_tgt
    cost_bbox = jnp.abs(obn[:, None, :] - tbn[None, :, :]).sum(-1)
    area1 = (out_bbox[:, 2] - out_bbox[:, 0]) * (out_bbox[:, 3] - out_bbox[:, 1])
    area2 = (tgt_bbox[:, 2] - tgt_bbox[:, 0]) * (tgt_bbox[:, 3] - tgt_bbox[:, 1])
    lt = jnp.maximum(out_bbox[:, None, :2], tgt_bbox[None, :, :2])
    rb = jnp.minimum(out_bbox[:, None, 2:], tgt_bbox[None, :, 2:])
    wh = jnp.clip(rb - lt, 0.0)
    inter = wh[..., 0] * wh[..., 1]
    union = area1[:, None] + area2[None, :] - inter
    iou = inter / union
    ltc = jnp.minimum(out_bbox[:, None, :2], tgt_bbox[None, :, :2])
    rbc = jnp.maximum(out_bbox[:, None, 2:], tgt_bbox[None, :, 2:])
    whc = jnp.clip(rbc - ltc, 0.0)
    carea = whc[..., 0] * whc[..., 1]
    giou = iou - (carea - union) / carea
    return wb * cost_bbox + wc * cost_class + wg * (-giou)


# ----------------------------------------------------------------------------- main
def _rand_boxes(key, n, w, h):
    k1, k2 = jax.random.split(key)
    u = jax.random.uniform(k1, (n, 2))
    v = jax.random.uniform(k2, (n, 2))
    x1 = u[:, 0] * w * 0.6
    y1 = u[:, 1] * h * 0.6
    x2 = x1 + v[:, 0] * w * 0.35 + 2.0
    y2 = y1 + v[:, 1] * h * 0.35 + 2.0
    return jnp.stack([x1, y1, x2, y2], axis=-1).astype(jnp.float32)


if __name__ == "__main__":
    key = jax.random.PRNGKey(0)
    bs, num_queries, num_classes = 2, 16, 32
    sizes = [3, 2]
    img_wh = [(640.0, 480.0), (512.0, 384.0)]

    k_log, k_box, k_tgt = jax.random.split(key, 3)
    pred_logits = jax.random.normal(k_log, (bs, num_queries, num_classes), jnp.float32)
    pred_boxes = jnp.stack(
        [_rand_boxes(jax.random.fold_in(k_box, b), num_queries, *img_wh[b]) for b in range(bs)], axis=0)

    targets = []
    for b in range(bs):
        kb = jax.random.fold_in(k_tgt, b)
        kl, kbx = jax.random.split(kb)
        nt = sizes[b]
        w, h = img_wh[b]
        labels = jax.random.randint(kl, (nt,), 0, num_classes, jnp.int32)
        boxes_xyxy = _rand_boxes(kbx, nt, w, h)
        image_size_xyxy = jnp.asarray([w, h, w, h], jnp.float32)
        targets.append({
            "labels": labels,
            "boxes": jnp.zeros((nt, 4), jnp.float32),  # only len() is used by the matcher
            "boxes_xyxy": boxes_xyxy,
            "image_size_xyxy": image_size_xyxy,
            "image_size_xyxy_tgt": jnp.tile(image_size_xyxy[None, :], (nt, 1)),
        })

    # tile_n=16 exercises the row-tiled grid (N=32 -> grid of 2 tiles) at demo sizes;
    # production default is tile_n=256.
    matcher = HungarianMatcher(cost_class=1.0, cost_bbox=1.0, cost_giou=1.0, tile_n=16)
    indices, C = matcher({"pred_logits": pred_logits, "pred_boxes": pred_boxes}, targets)
    jax.block_until_ready(C)

    # correctness check of the Pallas cost matrix vs a pure-JAX f32 reference
    # (tolerance loosened vs exact: bf16 logits + bf16 MXU operands + approx softmax recip)
    logits_f = pred_logits.reshape(bs * num_queries, num_classes)
    out_bbox_f = pred_boxes.reshape(bs * num_queries, 4)
    tgt_ids = jnp.concatenate([t["labels"] for t in targets])
    tgt_bbox = jnp.concatenate([t["boxes_xyxy"] for t in targets], axis=0)
    imgsz_out = jnp.repeat(jnp.stack([t["image_size_xyxy"] for t in targets])[:, None, :],
                           num_queries, axis=1).reshape(bs * num_queries, 4)
    imgsz_tgt = jnp.concatenate([t["image_size_xyxy_tgt"] for t in targets], axis=0)
    C_ref = _reference_cost(logits_f, out_bbox_f, imgsz_out, tgt_ids, tgt_bbox, imgsz_tgt,
                            1.0, 1.0, 1.0).reshape(bs, num_queries, -1)
    np.testing.assert_allclose(np.asarray(C), np.asarray(C_ref), rtol=2e-2, atol=2e-2)

    for (ri, ci), sz in zip(indices, sizes):
        assert len(ri) == len(ci) == min(num_queries, sz)

    print("KERNEL_OK")
</pallas_src>

<mosaic_0001>
module attributes {stable_mosaic.version = 11 : i64} {
  func.func @_cost_kernel(%arg0: i32, %arg1: memref<16x128xbf16, #tpu.memory_space<vmem>>, %arg2: memref<16x4xf32, #tpu.memory_space<vmem>>, %arg3: memref<16x4xf32, #tpu.memory_space<vmem>>, %arg4: memref<128x128xbf16, #tpu.memory_space<vmem>>, %arg5: memref<4x128xf32, #tpu.memory_space<vmem>>, %arg6: memref<4x128xf32, #tpu.memory_space<vmem>>, %arg7: memref<16x128xf32, #tpu.memory_space<vmem>>) attributes {dimension_semantics = [#tpu.dimension_semantics<parallel>], iteration_bounds = array<i64: 2>, scalar_prefetch = 0 : i64, scratch_operands = 0 : i64, tpu.core_type = #tpu.core_type<tc>, window_params = [{transform_indices = @transform_0, window_bounds = array<i64: 16, 128>}, {transform_indices = @transform_1, window_bounds = array<i64: 16, 4>}, {transform_indices = @transform_2, window_bounds = array<i64: 16, 4>}, {pipeline_mode = #tpu.pipeline_mode<synchronous>, transform_indices = @transform_3, window_bounds = array<i64: 128, 128>}, {pipeline_mode = #tpu.pipeline_mode<synchronous>, transform_indices = @transform_4, window_bounds = array<i64: 4, 128>}, {pipeline_mode = #tpu.pipeline_mode<synchronous>, transform_indices = @transform_5, window_bounds = array<i64: 4, 128>}, {transform_indices = @transform_6, window_bounds = array<i64: 16, 128>}]} {
    %c0 = arith.constant 0 : index
    %c0_0 = arith.constant 0 : index
    %0 = vector.load %arg1[%c0, %c0_0] : memref<16x128xbf16, #tpu.memory_space<vmem>>, vector<16x128xbf16>
    %1 = arith.extf %0 : vector<16x128xbf16> to vector<16x128xf32>
    %cst = arith.constant dense<0xFF800000> : vector<16xf32>
    %2 = vector.multi_reduction <maximumf>, %1, %cst [1] : vector<16x128xf32> to vector<16xf32>
    %3 = vector.shape_cast %2 : vector<16xf32> to vector<16x1xf32>
    %4 = vector.broadcast %3 : vector<16x1xf32> to vector<16x128xf32>
    %5 = arith.subf %1, %4 : vector<16x128xf32>
    %6 = math.exp %5 : vector<16x128xf32>
    %cst_1 = arith.constant dense<0.000000e+00> : vector<16xf32>
    %7 = vector.multi_reduction <add>, %6, %cst_1 [1] : vector<16x128xf32> to vector<16xf32>
    %8 = vector.shape_cast %7 : vector<16xf32> to vector<16x1xf32>
    %9 = tpu.reciprocal %8 {approx = true} : vector<16x1xf32> -> vector<16x1xf32>
    %10 = vector.broadcast %9 : vector<16x1xf32> to vector<16x128xf32>
    %11 = arith.mulf %6, %10 : vector<16x128xf32>
    %12 = arith.truncf %11 : vector<16x128xf32> to vector<16x128xbf16>
    %c0_2 = arith.constant 0 : index
    %c0_3 = arith.constant 0 : index
    %13 = vector.load %arg4[%c0_2, %c0_3] : memref<128x128xbf16, #tpu.memory_space<vmem>>, vector<128x128xbf16>
    %cst_4 = arith.constant dense<0.000000e+00> : vector<16x128xf32>
    %14 = tpu.matmul %12, %13, %cst_4 {dimension_numbers = #tpu.dot_dimension_numbers<[1], [0], [0], [1], [0, 0, 1, 1], [], []>} : vector<16x128xbf16>, vector<128x128xbf16>, vector<16x128xf32> -> vector<16x128xf32>
    %c0_5 = arith.constant 0 : index
    %c0_6 = arith.constant 0 : index
    %15 = vector.load %arg2[%c0_5, %c0_6] : memref<16x4xf32, #tpu.memory_space<vmem>>, vector<16x4xf32>
    %c0_7 = arith.constant 0 : index
    %c0_8 = arith.constant 0 : index
    %16 = vector.load %arg5[%c0_7, %c0_8] : memref<4x128xf32, #tpu.memory_space<vmem>>, vector<4x128xf32>
    %17 = vector.extract_strided_slice %15 {offsets = [0, 0], sizes = [16, 1], strides = [1, 1]} : vector<16x4xf32> to vector<16x1xf32>
    %18 = vector.extract_strided_slice %16 {offsets = [0, 0], sizes = [1, 128], strides = [1, 1]} : vector<4x128xf32> to vector<1x128xf32>
    %19 = vector.broadcast %17 : vector<16x1xf32> to vector<16x128xf32>
    %20 = vector.broadcast %18 : vector<1x128xf32> to vector<16x128xf32>
    %21 = arith.subf %19, %20 : vector<16x128xf32>
    %22 = math.absf %21 : vector<16x128xf32>
    %23 = vector.extract_strided_slice %15 {offsets = [0, 1], sizes = [16, 1], strides = [1, 1]} : vector<16x4xf32> to vector<16x1xf32>
    %24 = vector.extract_strided_slice %16 {offsets = [1, 0], sizes = [1, 128], strides = [1, 1]} : vector<4x128xf32> to vector<1x128xf32>
    %25 = vector.broadcast %23 : vector<16x1xf32> to vector<16x128xf32>
    %26 = vector.broadcast %24 : vector<1x128xf32> to vector<16x128xf32>
    %27 = arith.subf %25, %26 : vector<16x128xf32>
    %28 = math.absf %27 : vector<16x128xf32>
    %29 = arith.addf %22, %28 : vector<16x128xf32>
    %30 = vector.extract_strided_slice %15 {offsets = [0, 2], sizes = [16, 1], strides = [1, 1]} : vector<16x4xf32> to vector<16x1xf32>
    %31 = vector.extract_strided_slice %16 {offsets = [2, 0], sizes = [1, 128], strides = [1, 1]} : vector<4x128xf32> to vector<1x128xf32>
    %32 = vector.broadcast %30 : vector<16x1xf32> to vector<16x128xf32>
    %33 = vector.broadcast %31 : vector<1x128xf32> to vector<16x128xf32>
    %34 = arith.subf %32, %33 : vector<16x128xf32>
    %35 = math.absf %34 : vector<16x128xf32>
    %36 = arith.addf %29, %35 : vector<16x128xf32>
    %37 = vector.extract_strided_slice %15 {offsets = [0, 3], sizes = [16, 1], strides = [1, 1]} : vector<16x4xf32> to vector<16x1xf32>
    %38 = vector.extract_strided_slice %16 {offsets = [3, 0], sizes = [1, 128], strides = [1, 1]} : vector<4x128xf32> to vector<1x128xf32>
    %39 = vector.broadcast %37 : vector<16x1xf32> to vector<16x128xf32>
    %40 = vector.broadcast %38 : vector<1x128xf32> to vector<16x128xf32>
    %41 = arith.subf %39, %40 : vector<16x128xf32>
    %42 = math.absf %41 : vector<16x128xf32>
    %43 = arith.addf %36, %42 : vector<16x128xf32>
    %cst_9 = arith.constant 1.000000e+00 : f32
    %44 = vector.broadcast %cst_9 : f32 to vector<16x128xf32>
    %45 = arith.mulf %44, %43 : vector<16x128xf32>
    %46 = arith.addf %14, %45 : vector<16x128xf32>
    %c0_10 = arith.constant 0 : index
    %c0_11 = arith.constant 0 : index
    %47 = vector.load %arg3[%c0_10, %c0_11] : memref<16x4xf32, #tpu.memory_space<vmem>>, vector<16x4xf32>
    %c0_12 = arith.constant 0 : index
    %c0_13 = arith.constant 0 : index
    %48 = vector.load %arg6[%c0_12, %c0_13] : memref<4x128xf32, #tpu.memory_space<vmem>>, vector<4x128xf32>
    %49 = vector.extract_strided_slice %47 {offsets = [0, 0], sizes = [16, 1], strides = [1, 1]} : vector<16x4xf32> to vector<16x1xf32>
    %50 = vector.extract_strided_slice %47 {offsets = [0, 1], sizes = [16, 1], strides = [1, 1]} : vector<16x4xf32> to vector<16x1xf32>
    %51 = vector.extract_strided_slice %47 {offsets = [0, 2], sizes = [16, 1], strides = [1, 1]} : vector<16x4xf32> to vector<16x1xf32>
    %52 = vector.extract_strided_slice %47 {offsets = [0, 3], sizes = [16, 1], strides = [1, 1]} : vector<16x4xf32> to vector<16x1xf32>
    %53 = vector.extract_strided_slice %48 {offsets = [0, 0], sizes = [1, 128], strides = [1, 1]} : vector<4x128xf32> to vector<1x128xf32>
    %54 = vector.extract_strided_slice %48 {offsets = [1, 0], sizes = [1, 128], strides = [1, 1]} : vector<4x128xf32> to vector<1x128xf32>
    %55 = vector.extract_strided_slice %48 {offsets = [2, 0], sizes = [1, 128], strides = [1, 1]} : vector<4x128xf32> to vector<1x128xf32>
    %56 = vector.extract_strided_slice %48 {offsets = [3, 0], sizes = [1, 128], strides = [1, 1]} : vector<4x128xf32> to vector<1x128xf32>
    %57 = vector.broadcast %51 : vector<16x1xf32> to vector<16x128xf32>
    %58 = vector.broadcast %55 : vector<1x128xf32> to vector<16x128xf32>
    %59 = arith.minimumf %57, %58 : vector<16x128xf32>
    %60 = vector.broadcast %49 : vector<16x1xf32> to vector<16x128xf32>
    %61 = vector.broadcast %53 : vector<1x128xf32> to vector<16x128xf32>
    %62 = arith.maximumf %60, %61 : vector<16x128xf32>
    %63 = arith.subf %59, %62 : vector<16x128xf32>
    %cst_14 = arith.constant 0.000000e+00 : f32
    %64 = vector.broadcast %cst_14 : f32 to vector<16x128xf32>
    %65 = arith.maximumf %63, %64 : vector<16x128xf32>
    %66 = vector.broadcast %51 : vector<16x1xf32> to vector<16x128xf32>
    %67 = vector.broadcast %55 : vector<1x128xf32> to vector<16x128xf32>
    %68 = arith.maximumf %66, %67 : vector<16x128xf32>
    %69 = vector.broadcast %49 : vector<16x1xf32> to vector<16x128xf32>
    %70 = vector.broadcast %53 : vector<1x128xf32> to vector<16x128xf32>
    %71 = arith.minimumf %69, %70 : vector<16x128xf32>
    %72 = arith.subf %68, %71 : vector<16x128xf32>
    %cst_15 = arith.constant 0.000000e+00 : f32
    %73 = vector.broadcast %cst_15 : f32 to vector<16x128xf32>
    %74 = arith.maximumf %72, %73 : vector<16x128xf32>
    %75 = vector.broadcast %52 : vector<16x1xf32> to vector<16x128xf32>
    %76 = vector.broadcast %56 : vector<1x128xf32> to vector<16x128xf32>
    %77 = arith.minimumf %75, %76 : vector<16x128xf32>
    %78 = vector.broadcast %50 : vector<16x1xf32> to vector<16x128xf32>
    %79 = vector.broadcast %54 : vector<1x128xf32> to vector<16x128xf32>
    %80 = arith.maximumf %78, %79 : vector<16x128xf32>
    %81 = arith.subf %77, %80 : vector<16x128xf32>
    %cst_16 = arith.constant 0.000000e+00 : f32
    %82 = vector.broadcast %cst_16 : f32 to vector<16x128xf32>
    %83 = arith.maximumf %81, %82 : vector<16x128xf32>
    %84 = vector.broadcast %52 : vector<16x1xf32> to vector<16x128xf32>
    %85 = vector.broadcast %56 : vector<1x128xf32> to vector<16x128xf32>
    %86 = arith.maximumf %84, %85 : vector<16x128xf32>
    %87 = vector.broadcast %50 : vector<16x1xf32> to vector<16x128xf32>
    %88 = vector.broadcast %54 : vector<1x128xf32> to vector<16x128xf32>
    %89 = arith.minimumf %87, %88 : vector<16x128xf32>
    %90 = arith.subf %86, %89 : vector<16x128xf32>
    %cst_17 = arith.constant 0.000000e+00 : f32
    %91 = vector.broadcast %cst_17 : f32 to vector<16x128xf32>
    %92 = arith.maximumf %90, %91 : vector<16x128xf32>
    %93 = arith.mulf %65, %83 : vector<16x128xf32>
    %94 = arith.mulf %74, %92 : vector<16x128xf32>
    %95 = arith.subf %51, %49 : vector<16x1xf32>
    %96 = arith.subf %52, %50 : vector<16x1xf32>
    %97 = arith.mulf %95, %96 : vector<16x1xf32>
    %98 = arith.subf %55, %53 : vector<1x128xf32>
    %99 = arith.subf %56, %54 : vector<1x128xf32>
    %100 = arith.mulf %98, %99 : vector<1x128xf32>
    %101 = vector.broadcast %97 : vector<16x1xf32> to vector<16x128xf32>
    %102 = vector.broadcast %100 : vector<1x128xf32> to vector<16x128xf32>
    %103 = arith.addf %101, %102 : vector<16x128xf32>
    %104 = arith.subf %103, %93 : vector<16x128xf32>
    %105 = tpu.reciprocal %104 : vector<16x128xf32> -> vector<16x128xf32>
    %106 = arith.mulf %93, %105 : vector<16x128xf32>
    %cst_18 = arith.constant 1.000000e+00 : f32
    %107 = vector.broadcast %cst_18 : f32 to vector<16x128xf32>
    %108 = arith.subf %106, %107 : vector<16x128xf32>
    %109 = tpu.reciprocal %94 : vector<16x128xf32> -> vector<16x128xf32>
    %110 = arith.mulf %104, %109 : vector<16x128xf32>
    %111 = arith.addf %108, %110 : vector<16x128xf32>
    %cst_19 = arith.constant 1.000000e+00 : f32
    %112 = vector.broadcast %cst_19 : f32 to vector<16x128xf32>
    %113 = arith.mulf %112, %111 : vector<16x128xf32>
    %114 = arith.subf %46, %113 : vector<16x128xf32>
    %c0_20 = arith.constant 0 : index
    %c0_21 = arith.constant 0 : index
    %115 = vector.load %arg7[%c0_20, %c0_21] : memref<16x128xf32, #tpu.memory_space<vmem>>, vector<16x128xf32>
    tpu.vector_store %arg7[%c0_20, %c0_21], %114 {strides = array<i32>} : memref<16x128xf32, #tpu.memory_space<vmem>>, vector<16x128xf32>,
    return
  }
  func.func @transform_0(%arg0: i32) -> (i32, i32) {
    %c0_i32 = arith.constant 0 : i32
    %c0_i32_0 = arith.constant 0 : i32
    return %arg0, %c0_i32 : i32, i32
  }
  func.func @transform_1(%arg0: i32) -> (i32, i32) {
    %c0_i32 = arith.constant 0 : i32
    %c0_i32_0 = arith.constant 0 : i32
    return %arg0, %c0_i32 : i32, i32
  }
  func.func @transform_2(%arg0: i32) -> (i32, i32) {
    %c0_i32 = arith.constant 0 : i32
    %c0_i32_0 = arith.constant 0 : i32
    return %arg0, %c0_i32 : i32, i32
  }
  func.func @transform_3(%arg0: i32) -> (i32, i32) {
    %c0_i32 = arith.constant 0 : i32
    %c0_i32_0 = arith.constant 0 : i32
    %c0_i32_1 = arith.constant 0 : i32
    return %c0_i32, %c0_i32_0 : i32, i32
  }
  func.func @transform_4(%arg0: i32) -> (i32, i32) {
    %c0_i32 = arith.constant 0 : i32
    %c0_i32_0 = arith.constant 0 : i32
    %c0_i32_1 = arith.constant 0 : i32
    return %c0_i32, %c0_i32_0 : i32, i32
  }
  func.func @transform_5(%arg0: i32) -> (i32, i32) {
    %c0_i32 = arith.constant 0 : i32
    %c0_i32_0 = arith.constant 0 : i32
    %c0_i32_1 = arith.constant 0 : i32
    return %c0_i32, %c0_i32_0 : i32, i32
  }
  func.func @transform_6(%arg0: i32) -> (i32, i32) {
    %c0_i32 = arith.constant 0 : i32
    %c0_i32_0 = arith.constant 0 : i32
    return %arg0, %c0_i32 : i32, i32
  }
}

</mosaic_0001>

<bundles_post_ra>
// kernel: compute_cost_matrix.1
= control target key start
LH: loop header
LB: loop body
LE: loop exit
PB: predicated region body
PF: predicated region fallthrough
CT: control target
= control target key end

     0   :  { %s897_s21 = smov 0   ;;  %s1028_s0 = inlined_call_operand.vmem [shape: bf16[32,128], index: 0, kind: input, shape index: {}]   ;;  %s1029_s1 = inlined_call_operand.vmem [shape: f32[32,4], index: 1, kind: input, shape index: {}]   ;;  %s1030_s2 = inlined_call_operand.vmem [shape: f32[32,4], index: 2, kind: input, shape index: {}]   ;;  %s1031_s3 = inlined_call_operand.vmem [shape: bf16[128,128], index: 3, kind: input, shape index: {}]   ;;  %s1032_s4 = inlined_call_operand.vmem [shape: f32[4,128], index: 4, kind: input, shape index: {}]   ;;  %s1033_s5 = inlined_call_operand.vmem [shape: f32[4,128], index: 5, kind: input, shape index: {}]   ;;  %s1034_s6 = inlined_call_operand.vmem [shape: f32[32,128], index: 6, kind: output, shape index: {}]  }
   0x1 LB: > { %s732_s22 = sadd.s32 4294967295, %s852_s21   ;;  %p736_p0 = scmp.ge.s32.totalorder %s852_s21, 1  ;;  %s852_s21 = sphi %s897_s21, %s16_s21  }
   0x2   : > { %p235_p1 = scmp.lt.s32.totalorder %s852_s21, 3 }
   0x4   : > { %p236_p2 = pnand %p736_p0, %p235_p1 }
   0x5   : > { %s737_s23 = sshll.u32 (!%p236_p2), %s732_s22, 1  ;;  %s854_s8 = smov (!%p236_p2), 2   ;;  %v822_v4 = vld [vmem:[%s1031_s3] sm:$0xff] (!%p236_p2)   ;;  %v855_v5 = vmov (!%p236_p2), 0.0   ;;  %v823_v6 = vld [vmem:[%s1031_s3 + $0x8] sm:$0xff] (!%p236_p2)   ;;  %v824_v7 = vld [vmem:[%s1031_s3 + $0x10] sm:$0xff] (!%p236_p2)   ;;  %v352_v46 = vlaneseq (!%p236_p2) }
   0x6   : > { %239 = sbr.rel (%p236_p2) target bundleno = 597 (0x255), region = 44  ;;  %p276_p3 = scmp.lt.s32.totalorder (!%p236_p2), %s737_s23, 3  ;;  %770 = vmatprep.subr.bf16.mxu0 (!%p236_p2), %v855_v5  ;;  %v825_v16 = vld [vmem:[%s1031_s3 + $0x18] sm:$0xff] (!%p236_p2)   ;;  %v826_v17 = vld [vmem:[%s1031_s3 + $0x20] sm:$0xff] (!%p236_p2)   ;;  %v827_v20 = vld [vmem:[%s1031_s3 + $0x28] sm:$0xff] (!%p236_p2)   ;;  %v857_v23 = vmov (!%p236_p2), 0  }
   0x7   : > { %771 = vmatpush3.bf16.msra.mxu0 (!%p236_p2), %v822_v4  ;;  %v828_v22 = vld [vmem:[%s1031_s3 + $0x30] sm:$0xff] (!%p236_p2)   ;;  %806 = vset.pattern.permute.xlu1 (!%p236_p2), %v857_v23  ;;  %v829_v24 = vld [vmem:[%s1031_s3 + $0x38] sm:$0xff] (!%p236_p2)   ;;  %vm858_vm0 = vmmov (!%p236_p2), 0   ;;  %v859_v25 = vmov (!%p236_p2), 1   ;;  %v860_v26 = vmov (!%p236_p2), 3   ;;  %v861_v27 = vmov (!%p236_p2), 2  }
   0x8   : > { %772 = vmatprep.subr.bf16.mxu0 (!%p236_p2), %v855_v5  ;;  %786 = vmatprep.mubr.msk.bf16.mxu0 (!%p236_p2), %vm858_vm0, %v855_v5  ;;  %v353_v49 = vshrl.u32 (!%p236_p2), %v352_v46, 7  ;;  %v505_v50 = vld [vmem:[%s1033_s5] sm:$0xf] (!%p236_p2) }
   0x9   : > { %808 = vset.pattern.permute.xlu0 (!%p236_p2), %v859_v25  ;;  %v611_v52 = vrot.slane (!%p236_p2), %v505_v50, 6 }
   0xa   : > { %v370_v53 = vsub.s32 (!%p236_p2), 1, %v353_v49  ;;  %v354_v55 = vsub.s32 (!%p236_p2), 0, %v353_v49  ;;  %v406_v56 = vsub.s32 (!%p236_p2), 3, %v353_v49  ;;  %v388_v57 = vsub.s32 (!%p236_p2), 2, %v353_v49 }
   0xb   : > { %773 = vmatpush3.bf16.msra.mxu0 (!%p236_p2), %v823_v6  ;;  %v613_v58 = vsub.f32 (!%p236_p2), %v505_v50, %v611_v52 }
   0xc   : > { %774 = vmatprep.subr.bf16.mxu0 (!%p236_p2), %v855_v5  ;;  %v967_v59 = vrot.slane (!%p236_p2), %v505_v50, %v370_v53  ;;  %v969_v61 = vrot.slane (!%p236_p2), %v505_v50, %v354_v55  ;;  %v971_v62 = vrot.slane (!%p236_p2), %v505_v50, %v406_v56  ;;  %v973_v63 = vrot.slane (!%p236_p2), %v505_v50, %v388_v57 }
   0xd   : > { %s1036_s23 = smov (!%p276_p3, %s737_s23), 3 }
   0xe   : > { %s738_s24 = sshll.u32 %s1036_s23, 2  ;;  %s908_s28 = sshll.u32 %s1036_s23, 3 }
   0xf   : > { %s279_s27 = scalar_lea.vmem %s1028_s0, %s738_s24  ;;  %s914_s7 = scalar_lea.vmem %s1030_s2, %s908_s28  ;;  %775 = vmatpush3.bf16.msra.mxu0 %v824_v7 }
  0x10   : > { %v758_v0 = vld [vmem:[%s279_s27] sm:$0xff]   ;;  %776 = vmatprep.subr.bf16.mxu0 %v855_v5  ;;  %v504_v18 = vld [vmem:[%s914_s7 + $0x8] sm:$0xff]  ;;  %s856_s24 = smov 127   ;;  %s285_s30 = scalar_lea.vmem %s1029_s1, %s908_s28 }
  0x11   : > { %v759_v1 = vunpack.c.l.bf16 %v758_v0  ;;  %v760_v2 = vunpack.c.h.bf16 %v758_v0  ;;  %v917_v3 = vld [vmem:[%s914_s7] sm:$0xff]  ;;  %v340_v40 = vld [vmem:[%s285_s30 + $0x8] sm:$0xff]  ;;  %s1001_s13 = scalar_lea.vmem %s1034_s6, %s908_s28 }
  0x12   : > { %v339_v37 = vld [vmem:[%s285_s30] sm:$0xff] }
  0x13   : > { %304 = vmax.xlane.f32.xlu0 %v759_v1  ;;  %777 = vmatpush3.bf16.msra.mxu0 %v825_v16 }
  0x14   : > { %778 = vmatprep.subr.bf16.mxu0 %v855_v5 }
  0x17   : > { %306 = vmax.xlane.f32.xlu0 %v760_v2  ;;  %779 = vmatpush3.bf16.msra.mxu0 %v826_v17 }
  0x18   : > { %780 = vmatprep.subr.bf16.mxu0 %v855_v5 }
  0x1b   : > { %781 = vmatpush3.bf16.msra.mxu0 %v827_v20 }
  0x1c   : > { %782 = vmatprep.subr.bf16.mxu0 %v855_v5 }
  0x1f   : > { %783 = vmatpush3.bf16.msra.mxu0 %v828_v22  ;;  %v341_v22 = vld [vmem:[%s1032_s4] sm:$0xf] }
  0x20   : > { %784 = vmatprep.subr.bf16.mxu0 %v855_v5  ;;  %v615_v5 = vrot.slane %v613_v58, 1 }
  0x23   : > { %785 = vmatpush3.bf16.msra.mxu0 %v829_v24 }
  0x2d   : > { %592 = vrot.lane.b32.xlu0 %v917_v3, %s854_s8 }
  0x31   : > { %563 = vperm.xlu0 %808, %v917_v3  }
  0x35   : > { %811 = vset.pattern.permute.xlu0 %v860_v26 }
  0x36   : > { %553 = vperm.xlu0 %811, %v504_v18  }
  0x3a   : > { %812 = vset.pattern.permute.xlu0 %v861_v27 }
  0x3b   : > { %508 = vperm.xlu0 %812, %v917_v3  }
  0xa0   : > { %v305_v8 = vpop.xlane.xlu0 %304 }
  0xa1   : > { %v308_v9 = vsub.f32 %v759_v1, %v305_v8 }
  0xa3   : > { %v310_v10 = vmul.f32 1.442695, %v308_v9  ;;  %v617_v9 = vmul.f32 %v615_v5, %v613_v58 }
  0xa4   : > { %v307_v11 = vpop.xlane.xlu0 %306 }
  0xa5   : > { %830 = vpow2.f32 %v310_v10  ;;  %v309_v12 = vsub.f32 %v760_v2, %v307_v11 }
  0xa7   : > { %v312_v13 = vmul.f32 1.442695, %v309_v12  ;;  %v979_v12 = vrot.slane %v617_v9, %v388_v57 }
  0xa8   : > { %v593_v19 = vpop.permute.xlu0 %592 }
  0xa9   : > { %832 = vpow2.f32 %v312_v13  ;;  %v598_v21 = vsub.f32 %v917_v3, %v593_v19 }
  0xaf   : > { %v831_v14 = vpop.eup %830 }
  0xb0   : > { %314 = vadd.xlane.f32.xlu1 %v831_v14  ;;  %v564_v48 = vpop.permute.xlu0 %563 }
  0xb1   : > { %v574_v0 = vmax.f32 %v564_v48, %v967_v59  ;;  %v582_v16 = vmin.f32 %v564_v48, %v967_v59 }
  0xb3   : > { %v833_v15 = vpop.eup %832 }
  0xb4   : > { %316 = vadd.xlane.f32.xlu1 %v833_v15 }
  0xb5   : > { %v965_v54 = vpop.permute.xlu0 %553 }
  0xba   : > { %v509_v1 = vpop.permute.xlu0 %508 }
  0xbb   : > { %v520_v4 = vmin.f32 %v509_v1, %v973_v63  ;;  %v540_v17 = vmax.f32 %v509_v1, %v973_v63 }
  0xc5   : > { %594 = vrot.lane.b32.xlu1 %v504_v18, %s854_s8 }
  0xc9   : > { %602 = vrot.lane.b32.xlu1 %v598_v21, %s856_s24 }
 0x13d   : > { %v315_v28 = vpop.xlane.xlu1 %314 }
 0x13e   : > { %834 = vrcp.f32 %v315_v28 }
 0x141   : > { %v317_v29 = vpop.xlane.xlu1 %316 }
 0x142   : > { %836 = vrcp.f32 %v317_v29 }
 0x145   : > { %v595_v30 = vpop.permute.xlu1 %594 }
 0x146   : > { %v599_v31 = vsub.f32 %v504_v18, %v595_v30 }
 0x148   : > { %604 = vrot.lane.b32.xlu1 %v599_v31, %s856_s24  ;;  %v835_v32 = vpop.eup %834 }
 0x149   : > { %v320_v34 = vmul.f32 %v835_v32, %v831_v14  ;;  %v603_v38 = vpop.permute.xlu1 %602  ;;  %v389_v32 = vrot.slane %v341_v22, %v388_v57 }
 0x14a   : > { %v608_v39 = vmul.f32 %v603_v38, %v598_v21 }
 0x14c   : > { %v837_v33 = vpop.eup %836  ;;  %523 = vperm.xlu1 %806, %v917_v3  }
 0x14d   : > { %v321_v35 = vmul.f32 %v837_v33, %v833_v15 }
 0x14f   : > { %v322_v36 = vpack.c.bf16 %v321_v35, %v320_v34 }
 0x150   : > { %807 = vset.pattern.permute.xlu1 %v860_v26 }
 0x151   : > { %787 = vmatmul.mubr.bf16.vlgmr.msra.gmra.mrb[0].mxu0 %v322_v36  ;;  %549 = vperm.xlu1 %807, %v917_v3  }
 0x155   : > { %809 = vset.pattern.permute.xlu1 %v861_v27 }
 0x156   : > { %513 = vperm.xlu1 %809, %v504_v18  }
 0x15a   : > { %810 = vset.pattern.permute.xlu1 %v857_v23 }
 0x15b   : > { %527 = vperm.xlu1 %810, %v504_v18  }
 0x15f   : > { %813 = vset.pattern.permute.xlu1 %v859_v25 }
 0x160   : > { %567 = vperm.xlu1 %813, %v504_v18  }
 0x164   : > { %814 = vset.pattern.permute.xlu1 %v857_v23 }
 0x165   : > { %344 = vperm.xlu1 %814, %v339_v37  }
 0x169   : > { %815 = vset.pattern.permute.xlu1 %v859_v25 }
 0x16a   : > { %361 = vperm.xlu1 %815, %v339_v37  }
 0x16e   : > { %816 = vset.pattern.permute.xlu1 %v861_v27 }
 0x16f   : > { %620 = vperm.xlu1 %816, %v608_v39  }
 0x173   : > { %818 = vset.pattern.permute.xlu1 %v859_v25  ;;  %v991_v25 = vrot.slane %v341_v22, %v354_v55 }
 0x174   : > { %365 = vperm.xlu1 %818, %v340_v40  }
 0x178   : > { %819 = vset.pattern.permute.xlu1 %v861_v27 }
 0x179   : > { %379 = vperm.xlu1 %819, %v339_v37  }
 0x17d   : > { %821 = vset.pattern.permute.xlu1 %v860_v26  ;;  %v993_v26 = vrot.slane %v341_v22, %v370_v53 }
 0x17e   : > { %397 = vperm.xlu1 %821, %v339_v37   ;;  %v407_v37 = vrot.slane %v341_v22, %v406_v56 }
 0x182   : > { %401 = vperm.xlu1 %821, %v340_v40  }
 0x1ba   : > { %v605_v41 = vpop.permute.xlu1 %604 }
 0x1bb   : > { %v609_v42 = vmul.f32 %v605_v41, %v599_v31 }
 0x1bd   : > { %625 = vperm.xlu0 %812, %v609_v42  }
 0x1c1   : > { %817 = vset.pattern.permute.xlu0 %v857_v23 }
 0x1c2   : > { %349 = vperm.xlu0 %817, %v340_v40  }
 0x1c6   : > { %820 = vset.pattern.permute.xlu0 %v861_v27 }
 0x1c7   : > { %383 = vperm.xlu0 %820, %v340_v40  }
 0x1cb   : > { %v524_v43 = vpop.permute.xlu1 %523 }
 0x1cc   : > { %v534_v2 = vmax.f32 %v524_v43, %v969_v61  ;;  %v542_v14 = vmin.f32 %v524_v43, %v969_v61 }
 0x1ce   : > { %v536_v8 = vsub.f32 %v520_v4, %v534_v2  ;;  %v544_v21 = vsub.f32 %v540_v17, %v542_v14  ;;  %v561_v2 = vmin.f32 %v965_v54, %v971_v62 }
 0x1d0   : > { %v550_v44 = vpop.permute.xlu1 %549  ;;  %v538_v11 = vmax.f32 %v536_v8, 0.0  ;;  %v546_v28 = vmax.f32 %v544_v21, 0.0 }
 0x1d1   : > { %v560_v3 = vmin.f32 %v550_v44, %v971_v62  ;;  %v580_v15 = vmax.f32 %v550_v44, %v971_v62 }
 0x1d3   : > { %v576_v7 = vsub.f32 %v560_v3, %v574_v0  ;;  %v584_v20 = vsub.f32 %v580_v15, %v582_v16 }
 0x1d5   : > { %v956_v45 = vpop.permute.xlu1 %513  ;;  %v578_v10 = vmax.f32 %v576_v7, 0.0  ;;  %v586_v27 = vmax.f32 %v584_v20, 0.0 }
 0x1d6   : > { %v521_v1 = vmin.f32 %v956_v45, %v973_v63  ;;  %v541_v5 = vmax.f32 %v956_v45, %v973_v63 }
 0x1d7   : > { %v588_v18 = vmul.f32 %v578_v10, %v538_v11  ;;  %v590_v33 = vmul.f32 %v586_v27, %v546_v28 }
 0x1da   : > { %v958_v47 = vpop.permute.xlu1 %527 }
 0x1db   : > { %v535_v3 = vmax.f32 %v958_v47, %v969_v61  ;;  %v543_v7 = vmin.f32 %v958_v47, %v969_v61 }
 0x1dd   : > { %v537_v9 = vsub.f32 %v521_v1, %v535_v3  ;;  %v545_v11 = vsub.f32 %v541_v5, %v543_v7 }
 0x1df   : > { %v963_v51 = vpop.permute.xlu1 %567  ;;  %v539_v14 = vmax.f32 %v537_v9, 0.0  ;;  %v547_v16 = vmax.f32 %v545_v11, 0.0 }
 0x1e0   : > { %v575_v4 = vmax.f32 %v963_v51, %v967_v59  ;;  %v583_v8 = vmin.f32 %v963_v51, %v967_v59 }
 0x1e2   : > { %v577_v10 = vsub.f32 %v561_v2, %v575_v4 }
 0x1e4   : > { %v345_v60 = vpop.permute.xlu1 %344  ;;  %v579_v15 = vmax.f32 %v577_v10, 0.0 }
 0x1e5   : > { %v356_v30 = vsub.f32 %v345_v60, %v991_v25 }
 0x1e7   : > { %v358_v34 = vand.u32 2147483647, %v356_v30 }
 0x1e9   : > { %v362_v6 = vpop.permute.xlu1 %361 }
 0x1ea   : > { %v372_v31 = vsub.f32 %v362_v6, %v993_v26  ;;  %v581_v6 = vmax.f32 %v965_v54, %v971_v62 }
 0x1ec   : > { %v374_v35 = vand.u32 2147483647, %v372_v31 }
 0x1ee   : > { %v621_v13 = vpop.permute.xlu1 %620  ;;  %v376_v39 = vadd.f32 %v374_v35, %v358_v34 }
 0x1ef   : > { %v632_v19 = vadd.f32 %v979_v12, %v621_v13  ;;  %v585_v13 = vsub.f32 %v581_v6, %v583_v8 }
 0x1f1   : > { %v634_v24 = vsub.f32 %v632_v19, %v588_v18  ;;  %v587_v17 = vmax.f32 %v585_v13, 0.0  ;;  %v589_v19 = vmul.f32 %v579_v15, %v539_v14 }
 0x1f3   : > { %v989_v23 = vpop.permute.xlu1 %365  ;;  %838 = vrcp.f32 %v634_v24  ;;  %v591_v63 = vmul.f32 %v587_v17, %v547_v16 }
 0x1f4   : > { %840 = vrcp.f32 %v590_v33  ;;  %v373_v51 = vsub.f32 %v989_v23, %v993_v26 }
 0x1f6   : > { %v375_v21 = vand.u32 2147483647, %v373_v51 }
 0x1f8   : > { %v380_v29 = vpop.permute.xlu1 %379 }
 0x1f9   : > { %v390_v36 = vsub.f32 %v380_v29, %v389_v32 }
 0x1fb   : > { %v392_v40 = vand.u32 2147483647, %v390_v36 }
 0x1fd   : > { %v398_v38 = vpop.permute.xlu1 %397  ;;  %v839_v42 = vpop.eup %838  ;;  %v394_v44 = vadd.f32 %v392_v40, %v376_v39 }
 0x1fe   : > { %v408_v41 = vsub.f32 %v398_v38, %v407_v37  ;;  %v638_v43 = vmul.f32 %v839_v42, %v588_v18  ;;  %v841_v48 = vpop.eup %840 }
 0x1ff   : > { %v644_v52 = vmul.f32 %v841_v48, %v634_v24 }
 0x200   : > { %v410_v46 = vand.u32 2147483647, %v408_v41  ;;  %v753_v50 = vadd.f32 -1.0, %v638_v43 }
 0x201   : > { %v402_v59 = vpop.permute.xlu1 %401 }
 0x202   : > { %v412_v49 = vadd.f32 %v410_v46, %v394_v44  ;;  %v646_v57 = vadd.f32 %v753_v50, %v644_v52  ;;  %v409_v22 = vsub.f32 %v402_v59, %v407_v37 }
 0x204   : > { %v411_v29 = vand.u32 2147483647, %v409_v22 }
 0x224   : > { %v496_v53 = vpop.f32.mrb[0].mxu0 }
 0x225   : > { %v497_v55 = vadd.f32 %v496_v53, %v412_v49  ;;  %v788_v58 = vpop.f32.mrb[1].mxu0 }
 0x226   : > { %v499_v56 = vpop.f32.mrb[2].mxu0 }
 0x227   : > { %v648_v60 = vsub.f32 %v497_v55, %v646_v57  ;;  %v789_v0 = vpop.f32.mrb[3].mxu0 }
 0x229   : > { %650 = vst [vmem:[%s1001_s13] sm:$0xff] %v648_v60 }
 0x23c   : > { %v626_v18 = vpop.permute.xlu0 %625 }
 0x23d   : > { %v633_v45 = vadd.f32 %v979_v12, %v626_v18 }
 0x23f   : > { %v635_v54 = vsub.f32 %v633_v45, %v589_v19 }
 0x241   : > { %842 = vrcp.f32 %v635_v54  ;;  %v350_v62 = vpop.permute.xlu0 %349 }
 0x242   : > { %v357_v47 = vsub.f32 %v350_v62, %v991_v25  ;;  %844 = vrcp.f32 %v591_v63 }
 0x244   : > { %v359_v61 = vand.u32 2147483647, %v357_v47 }
 0x246   : > { %v384_v20 = vpop.permute.xlu0 %383  ;;  %v377_v27 = vadd.f32 %v375_v21, %v359_v61 }
 0x247   : > { %v391_v24 = vsub.f32 %v384_v20, %v389_v32 }
 0x249   : > { %v393_v28 = vand.u32 2147483647, %v391_v24 }
 0x24b   : > { %v843_v12 = vpop.eup %842  ;;  %v395_v30 = vadd.f32 %v393_v28, %v377_v27 }
 0x24c   : > { %v639_v31 = vmul.f32 %v843_v12, %v589_v19  ;;  %v845_v33 = vpop.eup %844 }
 0x24d   : > { %v413_v34 = vadd.f32 %v411_v29, %v395_v30  ;;  %v645_v35 = vmul.f32 %v845_v33, %v635_v54 }
 0x24e   : > { %v754_v25 = vadd.f32 -1.0, %v639_v31 }
 0x24f   : > { %v500_v36 = vadd.f32 %v499_v56, %v413_v34 }
 0x250   : > { %v647_v38 = vadd.f32 %v754_v25, %v645_v35 }
 0x252   : > { %v649_v23 = vsub.f32 %v500_v36, %v647_v38 }
 0x254   : > { %651 = vst [vmem:[%s1001_s13 + $0x8] sm:$0xff] %v649_v23 }
 0x255 PF: > { %s16_s21 = sadd.s32 1, %s852_s21  }
 0x256   : > { %p13_p4 = scmp.ge.s32.totalorder %s16_s21, 4  }
 0x258   :  { %15 = sbr.rel (!%p13_p4) target bundleno = 1 (0x1), region = 80 }

</bundles_post_ra>
